<compile_context>
chip_gen: v7x
topology: tpu7x:2x2x1
jax: 0.10.0
libtpu: 0.0.40
codegen_flags: <defaults>
</compile_context>

<pallas_src>
import functools

import jax
import jax.numpy as jnp
from jax.experimental import pallas as pl
from jax.experimental.pallas import tpu as pltpu

MARGIN = 2.0
PAIRWISE_EPS = 1e-6  # torch.nn.functional.pairwise_distance default eps


def _round_up(x, m):
    return ((x + m - 1) // m) * m


def _contrastive_loss_kernel(o1_ref, o2_ref, lab_ref, out_ref, acc_ref, *,
                             margin, true_b, inv_b):
    i = pl.program_id(0)

    @pl.when(i == 0)
    def _():
        acc_ref[0, 0] = jnp.float32(0.0)

    o1 = o1_ref[...].astype(jnp.float32)        # (TB, D)
    o2 = o2_ref[...].astype(jnp.float32)        # (TB, D)
    lab = lab_ref[...].astype(jnp.float32)      # (TB, 1)

    diff = o1 - o2 + PAIRWISE_EPS               # torch adds eps to the difference
    sq_sum = jnp.sum(diff * diff, axis=-1, keepdims=True)   # (TB, 1) == d**2
    dist = jnp.sqrt(sq_sum)                                  # only needed for hinge branch
    hinge = jnp.maximum(margin - dist, 0.0)                  # clamp(margin - d, min=0)

    per_row = (1.0 - lab) * sq_sum + lab * (hinge * hinge)   # (TB, 1)

    # Mask out rows past the true batch size (from wrapper-side padding).
    tb = per_row.shape[0]
    row_idx = jax.lax.broadcasted_iota(jnp.int32, (tb, 1), 0) + i * tb
    per_row = jnp.where(row_idx < true_b, per_row, 0.0)

    acc_ref[0, 0] += jnp.sum(per_row)

    @pl.when(i == pl.num_programs(0) - 1)
    def _():
        out_ref[0, 0] = acc_ref[0, 0] * inv_b


def contrastive_loss(output1, output2, label, *, margin=MARGIN, block_rows=512):
    B, D = output1.shape

    # Batch tile: multiple of 8 sublanes, capped so 2 inputs x 2 pipeline
    # buffers stay comfortably inside scoped VMEM on all generations.
    TB = min(block_rows, _round_up(B, 8))
    B_pad = _round_up(B, TB)

    label2d = label.reshape(B, 1).astype(jnp.float32)
    if B_pad != B:
        pad = B_pad - B
        output1 = jnp.pad(output1, ((0, pad), (0, 0)))
        output2 = jnp.pad(output2, ((0, pad), (0, 0)))
        label2d = jnp.pad(label2d, ((0, pad), (0, 0)))

    grid = (B_pad // TB,)
    kernel = functools.partial(
        _contrastive_loss_kernel,
        margin=float(margin),
        true_b=B,
        inv_b=1.0 / B,
    )

    out = pl.pallas_call(
        kernel,
        out_shape=jax.ShapeDtypeStruct((1, 1), jnp.float32),
        grid_spec=pltpu.PrefetchScalarGridSpec(
            num_scalar_prefetch=0,
            grid=grid,
            in_specs=[
                pl.BlockSpec((TB, D), lambda i: (i, 0)),
                pl.BlockSpec((TB, D), lambda i: (i, 0)),
                pl.BlockSpec((TB, 1), lambda i: (i, 0)),
            ],
            out_specs=pl.BlockSpec((1, 1), lambda i: (0, 0),
                                   memory_space=pltpu.SMEM),
            scratch_shapes=[pltpu.SMEM((1, 1), jnp.float32)],
        ),
        compiler_params=pltpu.CompilerParams(
            dimension_semantics=("arbitrary",),
        ),
    )(output1, output2, label2d)
    return out[0, 0]


def _reference(output1, output2, label, margin=MARGIN):
    diff = output1.astype(jnp.float32) - output2.astype(jnp.float32) + PAIRWISE_EPS
    dist = jnp.sqrt(jnp.sum(diff * diff, axis=-1))
    lab = label.astype(jnp.float32)
    hinge = jnp.maximum(margin - dist, 0.0)
    return jnp.mean((1.0 - lab) * dist ** 2 + lab * hinge ** 2)


if __name__ == "__main__":
    key = jax.random.PRNGKey(0)

    # Case 1: B multiple of 8 (single tile, no padding).
    k1, k2, k3, k4, k5, k6 = jax.random.split(key, 6)
    B, D = 8, 32
    o1 = jax.random.normal(k1, (B, D), dtype=jnp.float32)
    o2 = jax.random.normal(k2, (B, D), dtype=jnp.float32)
    lab = jax.random.bernoulli(k3, p=0.5, shape=(B,)).astype(jnp.float32)

    loss = jax.block_until_ready(contrastive_loss(o1, o2, lab))
    ref = _reference(o1, o2, lab)
    assert jnp.allclose(loss, ref, rtol=1e-5, atol=1e-5), (loss, ref)

    # Case 2: ragged batch (exercises in-kernel row mask / padding path).
    B2 = 10
    o1b = jax.random.normal(k4, (B2, D), dtype=jnp.float32)
    o2b = jax.random.normal(k5, (B2, D), dtype=jnp.float32)
    labb = jax.random.bernoulli(k6, p=0.5, shape=(B2,)).astype(jnp.float32)

    loss2 = jax.block_until_ready(contrastive_loss(o1b, o2b, labb))
    ref2 = _reference(o1b, o2b, labb)
    assert jnp.allclose(loss2, ref2, rtol=1e-5, atol=1e-5), (loss2, ref2)

    print("KERNEL_OK")
</pallas_src>

<mosaic_0001>
module attributes {stable_mosaic.version = 11 : i64} {
  func.func @_contrastive_loss_kernel(%arg0: i32, %arg1: memref<8x32xf32, #tpu.memory_space<vmem>>, %arg2: memref<8x32xf32, #tpu.memory_space<vmem>>, %arg3: memref<8x1xf32, #tpu.memory_space<vmem>>, %arg4: memref<1x1xf32, #tpu.memory_space<smem>>, %arg5: memref<1x1xf32, #tpu.memory_space<smem>>) attributes {dimension_semantics = [#tpu.dimension_semantics<arbitrary>], iteration_bounds = array<i64: 1>, scalar_prefetch = 0 : i64, scratch_operands = 1 : i64, tpu.core_type = #tpu.core_type<tc>, window_params = [{transform_indices = @transform_0, window_bounds = array<i64: 8, 32>}, {transform_indices = @transform_1, window_bounds = array<i64: 8, 32>}, {transform_indices = @transform_2, window_bounds = array<i64: 8, 1>}, {transform_indices = @transform_3, window_bounds = array<i64: 1, 1>}]} {
    %c0_i32 = arith.constant 0 : i32
    %0 = arith.cmpi eq, %arg0, %c0_i32 : i32
    %1 = arith.extui %0 : i1 to i32
    %c0_i32_0 = arith.constant 0 : i32
    %2 = arith.cmpi ne, %1, %c0_i32_0 : i32
    scf.if %2 {
      %cst_19 = arith.constant 0.000000e+00 : f32
      %c0_20 = arith.constant 0 : index
      %c0_21 = arith.constant 0 : index
      %41 = memref.load %arg5[%c0_20, %c0_21] : memref<1x1xf32, #tpu.memory_space<smem>>
      memref.store %cst_19, %arg5[%c0_20, %c0_21] : memref<1x1xf32, #tpu.memory_space<smem>>
    } else {
    }
    %c0 = arith.constant 0 : index
    %c0_1 = arith.constant 0 : index
    %3 = vector.load %arg1[%c0, %c0_1] : memref<8x32xf32, #tpu.memory_space<vmem>>, vector<8x32xf32>
    %c0_2 = arith.constant 0 : index
    %c0_3 = arith.constant 0 : index
    %4 = vector.load %arg2[%c0_2, %c0_3] : memref<8x32xf32, #tpu.memory_space<vmem>>, vector<8x32xf32>
    %c0_4 = arith.constant 0 : index
    %c0_5 = arith.constant 0 : index
    %5 = vector.load %arg3[%c0_4, %c0_5] : memref<8x1xf32, #tpu.memory_space<vmem>>, vector<8x1xf32>
    %6 = arith.subf %3, %4 : vector<8x32xf32>
    %cst = arith.constant 9.99999997E-7 : f32
    %7 = vector.broadcast %cst : f32 to vector<8x32xf32>
    %8 = arith.addf %6, %7 : vector<8x32xf32>
    %9 = arith.mulf %8, %8 : vector<8x32xf32>
    %cst_6 = arith.constant dense<0.000000e+00> : vector<8xf32>
    %10 = vector.multi_reduction <add>, %9, %cst_6 [1] : vector<8x32xf32> to vector<8xf32>
    %11 = vector.shape_cast %10 : vector<8xf32> to vector<8x1xf32>
    %12 = math.sqrt %11 : vector<8x1xf32>
    %cst_7 = arith.constant 2.000000e+00 : f32
    %13 = vector.broadcast %cst_7 : f32 to vector<8x1xf32>
    %14 = arith.subf %13, %12 : vector<8x1xf32>
    %cst_8 = arith.constant 0.000000e+00 : f32
    %15 = vector.broadcast %cst_8 : f32 to vector<8x1xf32>
    %16 = arith.maximumf %14, %15 : vector<8x1xf32>
    %cst_9 = arith.constant 1.000000e+00 : f32
    %17 = vector.broadcast %cst_9 : f32 to vector<8x1xf32>
    %18 = arith.subf %17, %5 : vector<8x1xf32>
    %19 = arith.mulf %18, %11 : vector<8x1xf32>
    %20 = arith.mulf %16, %16 : vector<8x1xf32>
    %21 = arith.mulf %5, %20 : vector<8x1xf32>
    %22 = arith.addf %19, %21 : vector<8x1xf32>
    %23 = tpu.iota {dimensions = array<i32: 0>} : vector<8x1xi32>
    %c8_i32 = arith.constant 8 : i32
    %24 = arith.muli %arg0, %c8_i32 : i32
    %25 = vector.broadcast %24 : i32 to vector<8x1xi32>
    %26 = arith.addi %23, %25 : vector<8x1xi32>
    %c8_i32_10 = arith.constant 8 : i32
    %27 = vector.broadcast %c8_i32_10 : i32 to vector<8x1xi32>
    %28 = arith.cmpi slt, %26, %27 : vector<8x1xi32>
    %cst_11 = arith.constant 0.000000e+00 : f32
    %29 = vector.broadcast %cst_11 : f32 to vector<8x1xf32>
    %30 = arith.select %28, %22, %29 : vector<8x1xi1>, vector<8x1xf32>
    %c0_12 = arith.constant 0 : index
    %c0_13 = arith.constant 0 : index
    %31 = memref.load %arg5[%c0_12, %c0_13] : memref<1x1xf32, #tpu.memory_space<smem>>
    %32 = vector.shape_cast %30 : vector<8x1xf32> to vector<1x8x1xf32>
    %cst_14 = arith.constant dense<0.000000e+00> : vector<1xf32>
    %33 = vector.multi_reduction <add>, %32, %cst_14 [1, 2] : vector<1x8x1xf32> to vector<1xf32>
    %34 = vector.shape_cast %33 : vector<1xf32> to vector<1x1x1xf32>
    %35 = vector.extract %34[0, 0, 0] : f32 from vector<1x1x1xf32>
    %36 = arith.addf %31, %35 : f32
    %c0_15 = arith.constant 0 : index
    %c0_16 = arith.constant 0 : index
    %37 = memref.load %arg5[%c0_15, %c0_16] : memref<1x1xf32, #tpu.memory_space<smem>>
    memref.store %36, %arg5[%c0_15, %c0_16] : memref<1x1xf32, #tpu.memory_space<smem>>
    %c0_i32_17 = arith.constant 0 : i32
    %38 = arith.cmpi eq, %arg0, %c0_i32_17 : i32
    %39 = arith.extui %38 : i1 to i32
    %c0_i32_18 = arith.constant 0 : i32
    %40 = arith.cmpi ne, %39, %c0_i32_18 : i32
    scf.if %40 {
      %c0_19 = arith.constant 0 : index
      %c0_20 = arith.constant 0 : index
      %41 = memref.load %arg5[%c0_19, %c0_20] : memref<1x1xf32, #tpu.memory_space<smem>>
      %cst_21 = arith.constant 1.250000e-01 : f32
      %42 = arith.mulf %41, %cst_21 : f32
      %c0_22 = arith.constant 0 : index
      %c0_23 = arith.constant 0 : index
      %43 = memref.load %arg4[%c0_22, %c0_23] : memref<1x1xf32, #tpu.memory_space<smem>>
      memref.store %42, %arg4[%c0_22, %c0_23] : memref<1x1xf32, #tpu.memory_space<smem>>
    } else {
    }
    return
  }
  func.func @transform_0(%arg0: i32) -> (i32, i32) {
    %c0_i32 = arith.constant 0 : i32
    %c0_i32_0 = arith.constant 0 : i32
    return %arg0, %c0_i32 : i32, i32
  }
  func.func @transform_1(%arg0: i32) -> (i32, i32) {
    %c0_i32 = arith.constant 0 : i32
    %c0_i32_0 = arith.constant 0 : i32
    return %arg0, %c0_i32 : i32, i32
  }
  func.func @transform_2(%arg0: i32) -> (i32, i32) {
    %c0_i32 = arith.constant 0 : i32
    %c0_i32_0 = arith.constant 0 : i32
    return %arg0, %c0_i32 : i32, i32
  }
  func.func @transform_3(%arg0: i32) -> (i32, i32) {
    %c0_i32 = arith.constant 0 : i32
    %c0_i32_0 = arith.constant 0 : i32
    %c0_i32_1 = arith.constant 0 : i32
    return %c0_i32, %c0_i32_0 : i32, i32
  }
}

</mosaic_0001>

<bundles_post_ra>
// kernel: tpu_custom_call.1
= control target key start
LH: loop header
LB: loop body
LE: loop exit
PB: predicated region body
PF: predicated region fallthrough
CT: control target
= control target key end

     0   :  { %8 = vsyncpa [#allocation4], 0  ;;  %s194_s0 = inlined_call_operand.vmem [shape: f32[8,32], index: 0, kind: input, shape index: {}]   ;;  %s195_s1 = inlined_call_operand.hbm [shape: f32[8,32], index: 1, kind: input, shape index: {}]   ;;  %s196_s2 = inlined_call_operand.vmem [shape: f32[8,1], index: 2, kind: input, shape index: {}]   ;;  %s197_s3 = inlined_call_operand.hbm [shape: f32[1,1], index: 3, kind: output, shape index: {}]  }
   0x1   :  { %9 = vsyncpa [#allocation5], 0  ;;  %s142_s12 = smov [#allocation3]   ;;  %s106_s16 = scalar_lea.hbm %s195_s1, 128 }
   0x2   :  { %s18_s13 = sshll.u32 %s142_s12, 4  ;;  %p107_p0 = scmp.ne.s32.totalorder %s195_s1, %s106_s16  ;;  %s19_s13 = int_to_ptr.vmem [resolvable:$true] %s18_s13 }
   0x3   :  { %p110_p1 = scmp.lt.u32.totalorder %s106_s16, %s195_s1 }
   0x5   :  { %p112_p2 = pnand %p110_p1, %p107_p0 }
   0x7   :  { %115 = shalt.err (!%p112_p2)
}
   0x8   :  { %s116_s21 = scalar_lea.vmem %s19_s13, 128  ;;  %p121_p4 = scmp.lt.s32.totalorder %s19_s13, %s19_s13 }
   0x9   :  { %p117_p3 = scmp.ne.s32.totalorder %s19_s13, %s116_s21  ;;  %p122_p5 = scmp.lt.s32.totalorder %s116_s21, %s116_s21 }
   0xb   :  { %p123_p6 = por %p122_p5, %p121_p4 }
   0xd   :  { %p124_p7 = pnand %p123_p6, %p117_p3 }
   0xf   :  { %127 = shalt.err (!%p124_p7)
}
  0x10   :  { %21 = dma.hbm_to_vmem [thread:$0]  %s195_s1, 128, %s19_s13, [#allocation4]  }
  0x11   :  { %138 = dma.done.wait [#allocation4], 128  }
  0x12   :  { %139 = vsyncadd [#allocation4], 4294967168  ;;  %v33_v0 = vld [vmem:[%s194_s0] sm:$0xff]  ;;  %vm39_vm0 = vcmask 261120   ;;  %vm65_vm3 = vcmask 7168   ;;  %s128_s29 = scalar_lea.hbm %s197_s3, 16 }
  0x13   :  { %v34_v1 = vld [vmem:[#allocation3] sm:$0xff]  ;;  %p129_p8 = scmp.ne.s32.totalorder %s197_s3, %s128_s29  ;;  %p132_p9 = scmp.lt.u32.totalorder %s128_s29, %s197_s3 }
  0x14   :  { %v36_v2 = vsub.f32 %v33_v0, %v34_v1  ;;  %v35_v11 = vld [vmem:[%s196_s2] sm:$0xff] }
  0x15   :  { %v52_v15 = vsub.f32 1.0, %v35_v11  ;;  %p134_p10 = pnand %p132_p9, %p129_p8 }
  0x16   :  { %v37_v3 = vadd.f32 1e-06, %v36_v2 }
  0x18   :  { %v38_v4 = vmul.f32 %v37_v3, %v37_v3 }
  0x1a   :  { %v40_v5 = vsel %vm39_vm0, %v38_v4, 0.0 }
  0x1b   :  { %41 = vadd.xlane.f32.xlu0 %v40_v5 }
  0xa8   :  { %v42_v6 = vpop.xlane.xlu0 %41 }
  0xa9   :  { %104 = vrsqrt.f32 %v42_v6  ;;  %vm45_vm1 = vcmp.eq.f32.partialorder %v42_v6, inf  ;;  %v48_v9 = vand.u32 2147483648, %v42_v6  ;;  %vm47_vm2 = vcmp.eq.f32.partialorder %v42_v6, 0.0 }
  0xaa   :  { %v53_v17 = vmul.f32 %v52_v15, %v42_v6 }
  0xb3   :  { %v105_v7 = vpop.eup %104 }
  0xb4   :  { %v44_v8 = vmul.f32 %v105_v7, %v42_v6 }
  0xb6   :  { %v46_v10 = vsel %vm45_vm1, %v42_v6, %v44_v8 }
  0xb7   :  { %v49_v12 = vsel %vm47_vm2, %v48_v9, %v46_v10 }
  0xb8   :  { %v50_v13 = vsub.f32 2.0, %v49_v12 }
  0xba   :  { %v51_v14 = vmax.f32 %v50_v13, 0.0 }
  0xbc   :  { %v54_v16 = vmul.f32 %v51_v14, %v51_v14 }
  0xbe   :  { %v55_v18 = vmul.f32 %v54_v16, %v35_v11 }
  0xc0   :  { %v56_v19 = vadd.f32 %v55_v18, %v53_v17 }
  0xc2   :  { %v66_v20 = vsel %vm65_vm3, %v56_v19, 0.0 }
  0xc3   :  { %67 = vadd.xlane.f32.xlu0 %v66_v20 }
 0x150   :  { %v68_v21 = vpop.xlane.xlu0 %67 }
 0x151   :  { %v69_v22 = vrot.slane %v68_v21, 4 }
 0x153   :  { %v70_v23 = vadd.f32 %v69_v22, %v68_v21 }
 0x155   :  { %v71_v24 = vrot.slane %v70_v23, 2 }
 0x157   :  { %v72_v25 = vadd.f32 %v71_v24, %v70_v23 }
 0x159   :  { %v73_v26 = vrot.slane %v72_v25, 1 }
 0x15b   :  { %v74_v27 = vadd.f32 %v73_v26, %v72_v25 }
 0x15d   :  { %100 = vpush %v74_v27 }
 0x18e   :  { %s101_s0 = spop %100 }
 0x18f   :  { %s83_s2 = smul.f32 0.125, %s101_s0 }
 0x191   :  { %85 = sst [smem:[#allocation6]] %s83_s2 }
 0x192   :  { %137 = shalt.err (!%p134_p10)
}
 0x193   :  { %s143_s7 = smov [#allocation6]  }
 0x194   :  { %93 = dma.smem_to_hbm %s143_s7, 16, %s197_s3, [#allocation5]  }
 0x195   :  { %140 = dma.done.wait [#allocation5], 16  }
 0x196   :  { %141 = vsyncadd [#allocation5], 4294967280 }
 0x197   :  { %97 = sfence }
 0x198   :  { %98 = vsyncpa [#allocation4], 1 }
 0x199   :  { %99 = vsyncpa [#allocation5], 1 }

</bundles_post_ra>
